<compile_context>
chip_gen: v7x
topology: tpu7x:2x2x1
jax: 0.10.0
libtpu: 0.0.40
codegen_flags: <defaults>
</compile_context>

<pallas_src>
import jax
import jax.numpy as jnp
from jax import lax
from jax.experimental import pallas as pl
from jax.experimental.pallas import tpu as pltpu

KH = KW = 5
CIN, COUT = 6, 16


def c2_kernel(p_ref, w_ref, b_ref, o_ref):
    """Fused Conv2d(6->16, 5x5) + ReLU + MaxPool2d(2,2) for one row block.

    p_ref: (4, bm, f)  im2col patches, phase-stacked (4 pooling phases)
    w_ref: (f, COUT)   reshaped conv weights (resident across the grid)
    b_ref: (1, COUT)   bias (resident across the grid)
    o_ref: (bm, COUT)  pooled + ReLU'd output rows
    """
    bm, cout = o_ref.shape
    f = w_ref.shape[0]

    # Flatten the phase axis into rows -> ONE MXU matmul for all four phases.
    p = p_ref[...].reshape(4 * bm, f)
    y = jnp.dot(p, w_ref[...], preferred_element_type=jnp.float32)  # (4*bm, COUT)

    # Max-pool = elementwise max over the four phase row-groups (tile-aligned
    # static slices since bm % 8 == 0).
    m = jnp.maximum(jnp.maximum(y[0 * bm:1 * bm], y[1 * bm:2 * bm]),
                    jnp.maximum(y[2 * bm:3 * bm], y[3 * bm:4 * bm]))

    # Bias hoisted after the max (identical across phases), ReLU last.
    o_ref[...] = jnp.maximum(m + b_ref[...], 0.0)


def _round_up(x, m):
    return (x + m - 1) // m * m


def _im2col_nhwc(x_nhwc, kh, kw):
    # glue: pure slicing / concatenation, feature order (ky, kx, ci)
    N, H, W, C = x_nhwc.shape
    oh, ow = H - kh + 1, W - kw + 1
    cols = []
    for ky in range(kh):
        for kx in range(kw):
            cols.append(x_nhwc[:, ky:ky + oh, kx:kx + ow, :])
    return jnp.concatenate(cols, axis=-1)          # (N, oh, ow, kh*kw*C)


def c2_forward(x_nchw, w_oihw, bias, *, block_rows=512):
    """Forward pass of LeNet C2: Conv2d(6,16,5,valid) -> ReLU -> MaxPool(2,2)."""
    N, C, H, W = x_nchw.shape
    assert C == CIN
    oh, ow = H - KH + 1, W - KW + 1            # conv output spatial
    ph, pw = oh // 2, ow // 2                  # pooled output spatial
    f = KH * KW * CIN
    M = N * ph * pw                            # pooled output rows

    # ---- glue: NCHW -> NHWC, im2col, phase stack (layout only) ----
    x_nhwc = jnp.transpose(x_nchw, (0, 2, 3, 1))
    patches = _im2col_nhwc(x_nhwc, KH, KW)     # (N, oh, ow, f)

    def phase(dy, dx):
        p = patches[:, dy:dy + 2 * ph:2, dx:dx + 2 * pw:2, :]   # (N, ph, pw, f)
        return p.reshape(M, f)

    pstk = jnp.stack([phase(0, 0), phase(0, 1), phase(1, 0), phase(1, 1)],
                     axis=0)                   # (4, M, f)

    # Row-block size: multiple of 8 sublanes; pad M so the grid tiles evenly.
    if M <= block_rows:
        bm = _round_up(max(M, 1), 8)
    else:
        bm = block_rows
    M_pad = _round_up(M, bm)
    if M_pad != M:
        pstk = jnp.pad(pstk, ((0, 0), (0, M_pad - M), (0, 0)))
    grid_m = M_pad // bm

    # weight (Cout, Cin, KH, KW) -> (KH, KW, Cin, Cout) -> (KH*KW*Cin, Cout)
    w2 = jnp.transpose(w_oihw, (2, 3, 1, 0)).reshape(f, COUT)
    b2 = bias.reshape(1, COUT)

    flops = 2 * 4 * M_pad * f * COUT
    bytes_accessed = 4 * (4 * M_pad * f + f * COUT + COUT + M_pad * COUT)

    out_flat = pl.pallas_call(
        c2_kernel,
        out_shape=jax.ShapeDtypeStruct((M_pad, COUT), jnp.float32),
        grid_spec=pltpu.PrefetchScalarGridSpec(
            num_scalar_prefetch=0,
            grid=(grid_m,),
            in_specs=[
                # phase-stacked patch rows: pipelined per row block
                pl.BlockSpec((4, bm, f), lambda i: (0, i, 0)),
                # weights / bias: constant block index -> stay resident in VMEM
                pl.BlockSpec((f, COUT), lambda i: (0, 0)),
                pl.BlockSpec((1, COUT), lambda i: (0, 0)),
            ],
            out_specs=pl.BlockSpec((bm, COUT), lambda i: (i, 0)),
        ),
        compiler_params=pltpu.CompilerParams(
            dimension_semantics=("parallel",)),
        cost_estimate=pl.CostEstimate(flops=flops, transcendentals=0,
                                      bytes_accessed=bytes_accessed),
    )(pstk, w2, b2)

    # glue: drop padded rows, back to PyTorch NCHW
    out = out_flat[:M].reshape(N, ph, pw, COUT)
    return jnp.transpose(out, (0, 3, 1, 2))


def _reference(x_nchw, w_oihw, bias):
    y = lax.conv_general_dilated(x_nchw, w_oihw, window_strides=(1, 1),
                                 padding="VALID",
                                 dimension_numbers=("NCHW", "OIHW", "NCHW"))
    y = y + bias.reshape(1, COUT, 1, 1)
    y = jnp.maximum(y, 0.0)
    return lax.reduce_window(y, -jnp.inf, lax.max,
                             window_dimensions=(1, 1, 2, 2),
                             window_strides=(1, 1, 2, 2), padding="VALID")


if __name__ == "__main__":
    key = jax.random.PRNGKey(0)
    k_x, k_w, k_b = jax.random.split(key, 3)

    # LeNet's C2 stage consumes a (N, 6, 14, 14) feature map.
    x = jax.random.normal(k_x, (2, CIN, 14, 14), dtype=jnp.float32)
    w = jax.random.normal(k_w, (COUT, CIN, KH, KW), dtype=jnp.float32) * 0.1
    b = jax.random.normal(k_b, (COUT,), dtype=jnp.float32) * 0.1

    out = jax.block_until_ready(c2_forward(x, w, b))
    assert out.shape == (2, COUT, 5, 5), out.shape
    ref = _reference(x, w, b)
    assert jnp.allclose(out, ref, atol=1e-4, rtol=1e-4), \
        float(jnp.max(jnp.abs(out - ref)))

    # Second check: exercises the multi-block pipelined grid path (M > 512).
    x2 = jax.random.normal(k_x, (32, CIN, 14, 14), dtype=jnp.float32)
    out2 = jax.block_until_ready(c2_forward(x2, w, b))
    ref2 = _reference(x2, w, b)
    assert out2.shape == (32, COUT, 5, 5), out2.shape
    assert jnp.allclose(out2, ref2, atol=1e-4, rtol=1e-4), \
        float(jnp.max(jnp.abs(out2 - ref2)))

    print("KERNEL_OK")
</pallas_src>

<mosaic_0001>
module attributes {stable_mosaic.version = 11 : i64} {
  func.func @c2_kernel(%arg0: i32, %arg1: memref<4x56x150xf32, #tpu.memory_space<vmem>>, %arg2: memref<150x16xf32, #tpu.memory_space<vmem>>, %arg3: memref<1x16xf32, #tpu.memory_space<vmem>>, %arg4: memref<56x16xf32, #tpu.memory_space<vmem>>) attributes {dimension_semantics = [#tpu.dimension_semantics<parallel>], iteration_bounds = array<i64: 1>, scalar_prefetch = 0 : i64, scratch_operands = 0 : i64, tpu.core_type = #tpu.core_type<tc>, window_params = [{transform_indices = @transform_0, window_bounds = array<i64: 4, 56, 150>}, {pipeline_mode = #tpu.pipeline_mode<synchronous>, transform_indices = @transform_1, window_bounds = array<i64: 150, 16>}, {pipeline_mode = #tpu.pipeline_mode<synchronous>, transform_indices = @transform_2, window_bounds = array<i64: 1, 16>}, {transform_indices = @transform_3, window_bounds = array<i64: 56, 16>}]} {
    %c0 = arith.constant 0 : index
    %c0_0 = arith.constant 0 : index
    %c0_1 = arith.constant 0 : index
    %0 = vector.load %arg1[%c0, %c0_0, %c0_1] : memref<4x56x150xf32, #tpu.memory_space<vmem>>, vector<4x56x150xf32>
    %1 = vector.shape_cast %0 : vector<4x56x150xf32> to vector<224x150xf32>
    %c0_2 = arith.constant 0 : index
    %c0_3 = arith.constant 0 : index
    %2 = vector.load %arg2[%c0_2, %c0_3] : memref<150x16xf32, #tpu.memory_space<vmem>>, vector<150x16xf32>
    %cst = arith.constant dense<0.000000e+00> : vector<224x16xf32>
    %3 = tpu.matmul %1, %2, %cst {dimension_numbers = #tpu.dot_dimension_numbers<[1], [0], [0], [1], [0, 0, 1, 1], [], []>} : vector<224x150xf32>, vector<150x16xf32>, vector<224x16xf32> -> vector<224x16xf32>
    %4 = vector.extract_strided_slice %3 {offsets = [0, 0], sizes = [56, 16], strides = [1, 1]} : vector<224x16xf32> to vector<56x16xf32>
    %5 = vector.extract_strided_slice %3 {offsets = [56, 0], sizes = [56, 16], strides = [1, 1]} : vector<224x16xf32> to vector<56x16xf32>
    %6 = arith.maximumf %4, %5 : vector<56x16xf32>
    %7 = vector.extract_strided_slice %3 {offsets = [112, 0], sizes = [56, 16], strides = [1, 1]} : vector<224x16xf32> to vector<56x16xf32>
    %8 = vector.extract_strided_slice %3 {offsets = [168, 0], sizes = [56, 16], strides = [1, 1]} : vector<224x16xf32> to vector<56x16xf32>
    %9 = arith.maximumf %7, %8 : vector<56x16xf32>
    %10 = arith.maximumf %6, %9 : vector<56x16xf32>
    %c0_4 = arith.constant 0 : index
    %c0_5 = arith.constant 0 : index
    %11 = vector.load %arg3[%c0_4, %c0_5] : memref<1x16xf32, #tpu.memory_space<vmem>>, vector<1x16xf32>
    %12 = vector.broadcast %11 : vector<1x16xf32> to vector<56x16xf32>
    %13 = arith.addf %10, %12 : vector<56x16xf32>
    %cst_6 = arith.constant 0.000000e+00 : f32
    %14 = vector.broadcast %cst_6 : f32 to vector<56x16xf32>
    %15 = arith.maximumf %13, %14 : vector<56x16xf32>
    %c0_7 = arith.constant 0 : index
    %c0_8 = arith.constant 0 : index
    %16 = vector.load %arg4[%c0_7, %c0_8] : memref<56x16xf32, #tpu.memory_space<vmem>>, vector<56x16xf32>
    tpu.vector_store %arg4[%c0_7, %c0_8], %15 {strides = array<i32>} : memref<56x16xf32, #tpu.memory_space<vmem>>, vector<56x16xf32>,
    return
  }
  func.func @transform_0(%arg0: i32) -> (i32, i32, i32) {
    %c0_i32 = arith.constant 0 : i32
    %c0_i32_0 = arith.constant 0 : i32
    %c0_i32_1 = arith.constant 0 : i32
    return %c0_i32, %arg0, %c0_i32_0 : i32, i32, i32
  }
  func.func @transform_1(%arg0: i32) -> (i32, i32) {
    %c0_i32 = arith.constant 0 : i32
    %c0_i32_0 = arith.constant 0 : i32
    %c0_i32_1 = arith.constant 0 : i32
    return %c0_i32, %c0_i32_0 : i32, i32
  }
  func.func @transform_2(%arg0: i32) -> (i32, i32) {
    %c0_i32 = arith.constant 0 : i32
    %c0_i32_0 = arith.constant 0 : i32
    %c0_i32_1 = arith.constant 0 : i32
    return %c0_i32, %c0_i32_0 : i32, i32
  }
  func.func @transform_3(%arg0: i32) -> (i32, i32) {
    %c0_i32 = arith.constant 0 : i32
    %c0_i32_0 = arith.constant 0 : i32
    return %arg0, %c0_i32 : i32, i32
  }
}

</mosaic_0001>

<bundles_post_ra>
// kernel: tpu_custom_call.1
= control target key start
LH: loop header
LB: loop body
LE: loop exit
PB: predicated region body
PF: predicated region fallthrough
CT: control target
= control target key end

     0   :  { %8 = vsyncpa [#allocation3], 0  ;;  %s558_s12 = smov [#allocation2]   ;;  %s750_s0 = inlined_call_operand.hbm [shape: f32[4,56,150], index: 0, kind: input, shape index: {}]   ;;  %s751_s1 = inlined_call_operand.vmem [shape: f32[150,16], index: 1, kind: input, shape index: {}]   ;;  %s752_s2 = inlined_call_operand.vmem [shape: f32[1,16], index: 2, kind: input, shape index: {}]   ;;  %s753_s3 = inlined_call_operand.vmem [shape: f32[56,16], index: 3, kind: output, shape index: {}]  }
   0x1   :  { %s14_s13 = sshll.u32 %s558_s12, 4  ;;  %s534_s16 = scalar_lea.hbm %s750_s0, 7168  ;;  %s15_s13 = int_to_ptr.vmem [resolvable:$true] %s14_s13 }
   0x2   :  { %p535_p0 = scmp.ne.s32.totalorder %s750_s0, %s534_s16  ;;  %p538_p1 = scmp.lt.u32.totalorder %s534_s16, %s750_s0 }
   0x4   :  { %p540_p2 = pnand %p538_p1, %p535_p0 }
   0x6   :  { %543 = shalt.err (!%p540_p2)
}
   0x7   :  { %s544_s21 = scalar_lea.vmem %s15_s13, 7168  ;;  %p549_p4 = scmp.lt.s32.totalorder %s15_s13, %s15_s13 }
   0x8   :  { %p545_p3 = scmp.ne.s32.totalorder %s15_s13, %s544_s21  ;;  %p550_p5 = scmp.lt.s32.totalorder %s544_s21, %s544_s21 }
   0xa   :  { %p551_p6 = por %p550_p5, %p549_p4 }
   0xc   :  { %p552_p7 = pnand %p551_p6, %p545_p3 }
   0xe   :  { %555 = shalt.err (!%p552_p7)
}
   0xf   :  { %s559_s22 = smov 256   ;;  %s560_s23 = smov 16  }
  0x10   :  { %20 = dma.hbm_to_vmem [thread:$0]  %s750_s0, 7168, %s15_s13, [#allocation3], %s559_s22, %s559_s22, %s560_s23  }
  0x11   :  { %556 = dma.done.wait [#allocation3], 7168  }
  0x12   :  { %557 = vsyncadd [#allocation3], 4294960128  ;;  %v561_v0 = vmov 0.0|0.0   ;;  %v84_v1 = vld [vmem:[%s751_s1] sm:$0xff]  ;;  %v85_v2 = vld [vmem:[%s751_s1 + $0x8] sm:$0xff]  ;;  %vm103_vm0 = vcmask 179200  }
  0x13   :  { %482 = vmatprep.subr.bf16.mxu0 %v561_v0  ;;  %509 = vmatprep.subr.bf16.mxu1 %v561_v0  ;;  %v86_v3 = vld [vmem:[%s751_s1 + $0x10] sm:$0xff]  ;;  %v483_v4 = vpack.c.bf16 %v85_v2, %v84_v1  ;;  %v87_v5 = vld [vmem:[%s751_s1 + $0x18] sm:$0xff]  ;;  %v88_v7 = vld [vmem:[%s751_s1 + $0x20] sm:$0xff]  ;;  %v562_v30 = vmov 0.0   ;;  %vm188_vm1 = vcmask 1045504   ;;  %vm439_vm2 = vcmask 130048  }
  0x14   :  { %v486_v6 = vpack.c.bf16 %v87_v5, %v86_v3  ;;  %v89_v8 = vld [vmem:[%s751_s1 + $0x28] sm:$0xff]  ;;  %v90_v12 = vld [vmem:[%s751_s1 + $0x30] sm:$0xff]  ;;  %v91_v13 = vld [vmem:[%s751_s1 + $0x38] sm:$0xff] }
  0x15   :  { %484 = vmatpush1.bf16.msra.mxu0 %v483_v4  ;;  %519 = vmatpush1.bf16.msra.mxu1 %v483_v4  ;;  %v29_v9 = vld [vmem:[#allocation2 + $0x8] sm:$0xff]  ;;  %v489_v11 = vpack.c.bf16 %v89_v8, %v88_v7  ;;  %v492_v14 = vpack.c.bf16 %v91_v13, %v90_v12  ;;  %v92_v15 = vld [vmem:[%s751_s1 + $0x40] sm:$0xff]  ;;  %v94_v18 = vld [vmem:[%s751_s1 + $0x50] sm:$0xff] }
  0x16   :  { %485 = vmatprep.subr.bf16.mxu0 %v561_v0  ;;  %510 = vmatprep.subr.bf16.mxu1 %v561_v0  ;;  %v57_v10 = vld [vmem:[#allocation2 + $0xe8] sm:$0xff]  ;;  %v95_v19 = vld [vmem:[%s751_s1 + $0x58] sm:$0xff]  ;;  %v96_v21 = vld [vmem:[%s751_s1 + $0x60] sm:$0xff] }
  0x17   :  { %453 = vmatprep.mubr.msk.f32.mxu0 %vm103_vm0, %v29_v9  ;;  %467 = vmatprep.mubr.msk.f32.mxu1 %vm103_vm0, %v57_v10  ;;  %v93_v16 = vld [vmem:[%s751_s1 + $0x48] sm:$0xff]  ;;  %v498_v20 = vpack.c.bf16 %v95_v19, %v94_v18  ;;  %v98_v24 = vld [vmem:[%s751_s1 + $0x70] sm:$0xff]  ;;  %v99_v25 = vld [vmem:[%s751_s1 + $0x78] sm:$0xff] }
  0x18   :  { %v495_v17 = vpack.c.bf16 %v93_v16, %v92_v15  ;;  %v97_v22 = vld [vmem:[%s751_s1 + $0x68] sm:$0xff]  ;;  %v504_v26 = vpack.c.bf16 %v99_v25, %v98_v24  ;;  %v100_v27 = vld [vmem:[%s751_s1 + $0x80] sm:$0xff]  ;;  %v102_v31 = vld [vmem:[%s751_s1 + $0x90] sm:$0x3f] }
  0x19   :  { %487 = vmatpush1.bf16.msra.mxu0 %v486_v6  ;;  %520 = vmatpush1.bf16.msra.mxu1 %v486_v6  ;;  %v501_v23 = vpack.c.bf16 %v97_v22, %v96_v21  ;;  %v101_v28 = vld [vmem:[%s751_s1 + $0x88] sm:$0xff]  ;;  %v28_v32 = vld [vmem:[#allocation2] sm:$0xff]  ;;  %v31_v34 = vld [vmem:[#allocation2 + $0x18] sm:$0xff] }
  0x1a   :  { %488 = vmatprep.subr.bf16.mxu0 %v561_v0  ;;  %511 = vmatprep.subr.bf16.mxu1 %v561_v0  ;;  %v507_v29 = vpack.c.bf16 %v101_v28, %v100_v27  ;;  %v56_v33 = vld [vmem:[#allocation2 + $0xe0] sm:$0xff]  ;;  %v59_v35 = vld [vmem:[#allocation2 + $0xf8] sm:$0xff]  ;;  %v30_v36 = vld [vmem:[#allocation2 + $0x10] sm:$0xff] }
  0x1b   :  { %v58_v37 = vld [vmem:[#allocation2 + $0xf0] sm:$0xff]  ;;  %v33_v38 = vld [vmem:[#allocation2 + $0x28] sm:$0xff]  ;;  %v32_v40 = vld [vmem:[#allocation2 + $0x20] sm:$0xff] }
  0x1c   :  { %v61_v39 = vld [vmem:[#allocation2 + $0x108] sm:$0xff]  ;;  %v60_v41 = vld [vmem:[#allocation2 + $0x100] sm:$0xff]  ;;  %v35_v42 = vld [vmem:[#allocation2 + $0x38] sm:$0xff] }
  0x1d   :  { %490 = vmatpush1.bf16.msra.mxu0 %v489_v11  ;;  %521 = vmatpush1.bf16.msra.mxu1 %v489_v11  ;;  %v63_v43 = vld [vmem:[#allocation2 + $0x118] sm:$0xff]  ;;  %v34_v44 = vld [vmem:[#allocation2 + $0x30] sm:$0xff]  ;;  %v37_v46 = vld [vmem:[#allocation2 + $0x48] sm:$0xff] }
  0x1e   :  { %491 = vmatprep.subr.bf16.mxu0 %v561_v0  ;;  %512 = vmatprep.subr.bf16.mxu1 %v561_v0  ;;  %v62_v45 = vld [vmem:[#allocation2 + $0x110] sm:$0xff]  ;;  %v65_v47 = vld [vmem:[#allocation2 + $0x128] sm:$0xff]  ;;  %v36_v48 = vld [vmem:[#allocation2 + $0x40] sm:$0xff] }
  0x1f   :  { %v64_v49 = vld [vmem:[#allocation2 + $0x120] sm:$0xff]  ;;  %v39_v50 = vld [vmem:[#allocation2 + $0x58] sm:$0xff]  ;;  %v38_v52 = vld [vmem:[#allocation2 + $0x50] sm:$0xff] }
  0x20   :  { %v67_v51 = vld [vmem:[#allocation2 + $0x138] sm:$0xff]  ;;  %v66_v53 = vld [vmem:[#allocation2 + $0x130] sm:$0xff]  ;;  %v41_v54 = vld [vmem:[#allocation2 + $0x68] sm:$0xff] }
  0x21   :  { %493 = vmatpush1.bf16.msra.mxu0 %v492_v14  ;;  %522 = vmatpush1.bf16.msra.mxu1 %v492_v14  ;;  %v69_v55 = vld [vmem:[#allocation2 + $0x148] sm:$0xff]  ;;  %v40_v56 = vld [vmem:[#allocation2 + $0x60] sm:$0xff]  ;;  %v43_v58 = vld [vmem:[#allocation2 + $0x78] sm:$0xff] }
  0x22   :  { %494 = vmatprep.subr.bf16.mxu0 %v561_v0  ;;  %513 = vmatprep.subr.bf16.mxu1 %v561_v0  ;;  %v68_v57 = vld [vmem:[#allocation2 + $0x140] sm:$0xff]  ;;  %v71_v59 = vld [vmem:[#allocation2 + $0x158] sm:$0xff]  ;;  %v42_v60 = vld [vmem:[#allocation2 + $0x70] sm:$0xff] }
  0x23   :  { %v70_v61 = vld [vmem:[#allocation2 + $0x150] sm:$0xff]  ;;  %v45_v62 = vld [vmem:[#allocation2 + $0x88] sm:$0xff]  ;;  %v72_v1 = vld [vmem:[#allocation2 + $0x160] sm:$0xff] }
  0x24   :  { %v73_v63 = vld [vmem:[#allocation2 + $0x168] sm:$0xff]  ;;  %v47_v2 = vld [vmem:[#allocation2 + $0x98] sm:$0xff]  ;;  %v46_v4 = vld [vmem:[#allocation2 + $0x90] sm:$0xff] }
  0x25   :  { %496 = vmatpush1.bf16.msra.mxu0 %v495_v17  ;;  %523 = vmatpush1.bf16.msra.mxu1 %v495_v17  ;;  %v75_v3 = vld [vmem:[#allocation2 + $0x178] sm:$0xff]  ;;  %v74_v5 = vld [vmem:[#allocation2 + $0x170] sm:$0xff]  ;;  %v49_v6 = vld [vmem:[#allocation2 + $0xa8] sm:$0xff] }
  0x26   :  { %497 = vmatprep.subr.bf16.mxu0 %v561_v0  ;;  %514 = vmatprep.subr.bf16.mxu1 %v561_v0  ;;  %v77_v7 = vld [vmem:[#allocation2 + $0x188] sm:$0xff]  ;;  %v48_v8 = vld [vmem:[#allocation2 + $0xa0] sm:$0xff]  ;;  %v51_v10 = vld [vmem:[#allocation2 + $0xb8] sm:$0xff] }
  0x27   :  { %v76_v9 = vld [vmem:[#allocation2 + $0x180] sm:$0xff]  ;;  %v79_v11 = vld [vmem:[#allocation2 + $0x198] sm:$0xff]  ;;  %v50_v12 = vld [vmem:[#allocation2 + $0xb0] sm:$0xff] }
  0x28   :  { %v78_v13 = vld [vmem:[#allocation2 + $0x190] sm:$0xff]  ;;  %v53_v14 = vld [vmem:[#allocation2 + $0xc8] sm:$0xff]  ;;  %v52_v16 = vld [vmem:[#allocation2 + $0xc0] sm:$0xff] }
  0x29   :  { %499 = vmatpush1.bf16.msra.mxu0 %v498_v20  ;;  %524 = vmatpush1.bf16.msra.mxu1 %v498_v20  ;;  %v81_v15 = vld [vmem:[#allocation2 + $0x1a8] sm:$0xff]  ;;  %v80_v17 = vld [vmem:[#allocation2 + $0x1a0] sm:$0xff]  ;;  %v55_v18 = vld [vmem:[#allocation2 + $0xd8] sm:$0xff] }
  0x2a   :  { %500 = vmatprep.subr.bf16.mxu0 %v561_v0  ;;  %515 = vmatprep.subr.bf16.mxu1 %v561_v0  ;;  %v83_v19 = vld [vmem:[#allocation2 + $0x1b8] sm:$0xff]  ;;  %v54_v20 = vld [vmem:[#allocation2 + $0xd0] sm:$0xff] }
  0x2b   :  { %v82_v21 = vld [vmem:[#allocation2 + $0x1b0] sm:$0xff] }
  0x2d   :  { %502 = vmatpush1.bf16.msra.mxu0 %v501_v23  ;;  %525 = vmatpush1.bf16.msra.mxu1 %v501_v23 }
  0x2e   :  { %503 = vmatprep.subr.bf16.mxu0 %v561_v0  ;;  %516 = vmatprep.subr.bf16.mxu1 %v561_v0 }
  0x31   :  { %505 = vmatpush1.bf16.msra.mxu0 %v504_v26  ;;  %526 = vmatpush1.bf16.msra.mxu1 %v504_v26 }
  0x32   :  { %506 = vmatprep.subr.bf16.mxu0 %v561_v0  ;;  %517 = vmatprep.subr.bf16.mxu1 %v561_v0  ;;  %v44_v0 = vld [vmem:[#allocation2 + $0x80] sm:$0xff] }
  0x35   :  { %508 = vmatpush1.bf16.msra.mxu0 %v507_v29  ;;  %527 = vmatpush1.bf16.msra.mxu1 %v507_v29 }
  0x36   :  { %228 = vmatprep.subr.mxu0 %v562_v30  ;;  %518 = vmatprep.subr.mxu1 %v562_v30 }
  0x39   :  { %452 = vmatpush1.msk.msra.mxu0 %vm188_vm1, %v102_v31  ;;  %528 = vmatpush1.msk.msra.mxu1 %vm188_vm1, %v102_v31 }
  0x3a   :  { %257 = vmatmul.mubr.f32.vlgmr.msra.gmra.mrb[0].mxu0 %v28_v32  ;;  %327 = vmatmul.mubr.f32.vlgmr.msra.gmra.mrb[0].mxu1 %v56_v33 }
  0x3b   :  { %454 = vmatprep.mubr.msk.f32.mxu0 %vm103_vm0, %v31_v34  ;;  %468 = vmatprep.mubr.msk.f32.mxu1 %vm103_vm0, %v59_v35 }
  0x3e   :  { %262 = vmatmul.mubr.f32.gmra.mrb[2].mxu0 %v30_v36  ;;  %332 = vmatmul.mubr.f32.gmra.mrb[2].mxu1 %v58_v37 }
  0x3f   :  { %455 = vmatprep.mubr.msk.f32.mxu0 %vm103_vm0, %v33_v38  ;;  %469 = vmatprep.mubr.msk.f32.mxu1 %vm103_vm0, %v61_v39 }
  0x42   :  { %267 = vmatmul.mubr.f32.gmra.mrb[4].mxu0 %v32_v40  ;;  %337 = vmatmul.mubr.f32.gmra.mrb[4].mxu1 %v60_v41 }
  0x43   :  { %456 = vmatprep.mubr.msk.f32.mxu0 %vm103_vm0, %v35_v42  ;;  %470 = vmatprep.mubr.msk.f32.mxu1 %vm103_vm0, %v63_v43 }
  0x46   :  { %272 = vmatmul.mubr.f32.gmra.mrb[6].mxu0 %v34_v44  ;;  %342 = vmatmul.mubr.f32.gmra.mrb[6].mxu1 %v62_v45 }
  0x47   :  { %457 = vmatprep.mubr.msk.f32.mxu0 %vm103_vm0, %v37_v46  ;;  %471 = vmatprep.mubr.msk.f32.mxu1 %vm103_vm0, %v65_v47 }
  0x4a   :  { %277 = vmatmul.mubr.f32.gmra.mrb[8].mxu0 %v36_v48  ;;  %347 = vmatmul.mubr.f32.gmra.mrb[8].mxu1 %v64_v49 }
  0x4b   :  { %458 = vmatprep.mubr.msk.f32.mxu0 %vm103_vm0, %v39_v50  ;;  %472 = vmatprep.mubr.msk.f32.mxu1 %vm103_vm0, %v67_v51 }
  0x4e   :  { %282 = vmatmul.mubr.f32.gmra.mrb[10].mxu0 %v38_v52  ;;  %352 = vmatmul.mubr.f32.gmra.mrb[10].mxu1 %v66_v53 }
  0x4f   :  { %459 = vmatprep.mubr.msk.f32.mxu0 %vm103_vm0, %v41_v54  ;;  %473 = vmatprep.mubr.msk.f32.mxu1 %vm103_vm0, %v69_v55 }
  0x52   :  { %287 = vmatmul.mubr.f32.gmra.mrb[12].mxu0 %v40_v56  ;;  %357 = vmatmul.mubr.f32.gmra.mrb[12].mxu1 %v68_v57  ;;  %v709_v56 = vld [vmem:[%s752_s2] ss:$0 sm:$0xff] }
  0x53   :  { %460 = vmatprep.mubr.msk.f32.mxu0 %vm103_vm0, %v43_v58  ;;  %474 = vmatprep.mubr.msk.f32.mxu1 %vm103_vm0, %v71_v59 }
  0x56   :  { %292 = vmatmul.mubr.f32.gmra.mrb[14].mxu0 %v42_v60  ;;  %362 = vmatmul.mubr.f32.gmra.mrb[14].mxu1 %v70_v61 }
  0x57   :  { %461 = vmatprep.mubr.msk.f32.mxu0 %vm103_vm0, %v45_v62  ;;  %475 = vmatprep.mubr.msk.f32.mxu1 %vm103_vm0, %v73_v63 }
  0x5a   :  { %297 = vmatmul.mubr.f32.gmra.mrb[16].mxu0 %v44_v0  ;;  %367 = vmatmul.mubr.f32.gmra.mrb[16].mxu1 %v72_v1 }
  0x5b   :  { %462 = vmatprep.mubr.msk.f32.mxu0 %vm103_vm0, %v47_v2  ;;  %476 = vmatprep.mubr.msk.f32.mxu1 %vm103_vm0, %v75_v3 }
  0x5e   :  { %302 = vmatmul.mubr.f32.gmra.mrb[18].mxu0 %v46_v4  ;;  %372 = vmatmul.mubr.f32.gmra.mrb[18].mxu1 %v74_v5 }
  0x5f   :  { %463 = vmatprep.mubr.msk.f32.mxu0 %vm103_vm0, %v49_v6  ;;  %477 = vmatprep.mubr.msk.f32.mxu1 %vm103_vm0, %v77_v7 }
  0x62   :  { %307 = vmatmul.mubr.f32.gmra.mrb[20].mxu0 %v48_v8  ;;  %377 = vmatmul.mubr.f32.gmra.mrb[20].mxu1 %v76_v9 }
  0x63   :  { %464 = vmatprep.mubr.msk.f32.mxu0 %vm103_vm0, %v51_v10  ;;  %478 = vmatprep.mubr.msk.f32.mxu1 %vm103_vm0, %v79_v11 }
  0x66   :  { %312 = vmatmul.mubr.f32.gmra.mrb[22].mxu0 %v50_v12  ;;  %382 = vmatmul.mubr.f32.gmra.mrb[22].mxu1 %v78_v13 }
  0x67   :  { %465 = vmatprep.mubr.msk.f32.mxu0 %vm103_vm0, %v53_v14  ;;  %479 = vmatprep.mubr.msk.f32.mxu1 %vm103_vm0, %v81_v15 }
  0x6a   :  { %317 = vmatmul.mubr.f32.gmra.mrb[24].mxu0 %v52_v16  ;;  %387 = vmatmul.mubr.f32.gmra.mrb[24].mxu1 %v80_v17 }
  0x6b   :  { %466 = vmatprep.mubr.msk.f32.mxu0 %vm103_vm0, %v55_v18  ;;  %480 = vmatprep.mubr.msk.f32.mxu1 %vm103_vm0, %v83_v19 }
  0x6e   :  { %322 = vmatmul.mubr.f32.gmra.mrb[26].mxu0 %v54_v20  ;;  %392 = vmatmul.mubr.f32.gmra.mrb[26].mxu1 %v82_v21 }
 0x10d   :  { %v258_v22 = vpop.f32.mrb[0].mxu0  ;;  %v328_v23 = vpop.f32.mrb[0].mxu1 }
 0x10e   :  { %v260_v24 = vpop.f32.mrb[1].mxu0  ;;  %v330_v25 = vpop.f32.mrb[1].mxu1 }
 0x111   :  { %v263_v26 = vpop.f32.mrb[2].mxu0  ;;  %v333_v27 = vpop.f32.mrb[2].mxu1 }
 0x112   :  { %v265_v28 = vpop.f32.mrb[3].mxu0  ;;  %v335_v29 = vpop.f32.mrb[3].mxu1 }
 0x115   :  { %v268_v30 = vpop.f32.mrb[4].mxu0  ;;  %v338_v31 = vpop.f32.mrb[4].mxu1 }
 0x116   :  { %v270_v32 = vpop.f32.mrb[5].mxu0  ;;  %v340_v33 = vpop.f32.mrb[5].mxu1 }
 0x119   :  { %v273_v34 = vpop.f32.mrb[6].mxu0  ;;  %v343_v35 = vpop.f32.mrb[6].mxu1 }
 0x11a   :  { %v275_v36 = vpop.f32.mrb[7].mxu0  ;;  %v345_v37 = vpop.f32.mrb[7].mxu1 }
 0x11d   :  { %v278_v38 = vpop.f32.mrb[8].mxu0  ;;  %v348_v39 = vpop.f32.mrb[8].mxu1 }
 0x11e   :  { %v280_v40 = vpop.f32.mrb[9].mxu0  ;;  %v350_v41 = vpop.f32.mrb[9].mxu1 }
 0x121   :  { %v698_v42 = vpop.f32.mrb[10].mxu0  ;;  %v700_v43 = vpop.f32.mrb[10].mxu1 }
 0x122   :  { %v285_v44 = vpop.f32.mrb[11].mxu0  ;;  %v355_v45 = vpop.f32.mrb[11].mxu1 }
 0x125   :  { %v702_v46 = vpop.f32.mrb[12].mxu0  ;;  %v704_v47 = vpop.f32.mrb[12].mxu1 }
 0x126   :  { %v290_v48 = vpop.f32.mrb[13].mxu0  ;;  %v360_v49 = vpop.f32.mrb[13].mxu1 }
 0x129   :  { %v293_v50 = vpop.f32.mrb[14].mxu0  ;;  %v363_v51 = vpop.f32.mrb[14].mxu1 }
 0x12a   :  { %v397_v52 = vmax.f32 %v258_v22, %v293_v50  ;;  %v404_v53 = vmax.f32 %v328_v23, %v363_v51  ;;  %v295_v54 = vpop.f32.mrb[15].mxu0  ;;  %v365_v55 = vpop.f32.mrb[15].mxu1 }
 0x12c   :  { %v411_v57 = vmax.f32 %v397_v52, %v404_v53 }
 0x12d   :  { %v298_v58 = vpop.f32.mrb[16].mxu0  ;;  %v368_v59 = vpop.f32.mrb[16].mxu1 }
 0x12e   :  { %v425_v60 = vadd.f32 %v709_v56, %v411_v57  ;;  %v398_v61 = vmax.f32 %v263_v26, %v298_v58  ;;  %v405_v62 = vmax.f32 %v333_v27, %v368_v59  ;;  %v300_v63 = vpop.f32.mrb[17].mxu0  ;;  %v370_v0 = vpop.f32.mrb[17].mxu1 }
 0x130   :  { %v432_v1 = vmax.f32 %v425_v60, 0.0  ;;  %v412_v2 = vmax.f32 %v398_v61, %v405_v62 }
 0x131   :  { %v303_v3 = vpop.f32.mrb[18].mxu0  ;;  %v373_v4 = vpop.f32.mrb[18].mxu1 }
 0x132   :  { %440 = vst.msk [vmem:[%s753_s3] sm:$0xff] %vm439_vm2, %v432_v1  ;;  %v426_v5 = vadd.f32 %v709_v56, %v412_v2  ;;  %v399_v6 = vmax.f32 %v268_v30, %v303_v3  ;;  %v406_v7 = vmax.f32 %v338_v31, %v373_v4  ;;  %v305_v8 = vpop.f32.mrb[19].mxu0  ;;  %v375_v9 = vpop.f32.mrb[19].mxu1 }
 0x134   :  { %v433_v10 = vmax.f32 %v426_v5, 0.0  ;;  %v413_v11 = vmax.f32 %v399_v6, %v406_v7 }
 0x135   :  { %v308_v12 = vpop.f32.mrb[20].mxu0  ;;  %v378_v13 = vpop.f32.mrb[20].mxu1 }
 0x136   :  { %441 = vst.msk [vmem:[%s753_s3 + $0x8] sm:$0xff] %vm439_vm2, %v433_v10  ;;  %v427_v14 = vadd.f32 %v709_v56, %v413_v11  ;;  %v400_v15 = vmax.f32 %v273_v34, %v308_v12  ;;  %v407_v16 = vmax.f32 %v343_v35, %v378_v13  ;;  %v310_v17 = vpop.f32.mrb[21].mxu0  ;;  %v380_v18 = vpop.f32.mrb[21].mxu1 }
 0x138   :  { %v434_v19 = vmax.f32 %v427_v14, 0.0  ;;  %v414_v20 = vmax.f32 %v400_v15, %v407_v16 }
 0x139   :  { %v313_v21 = vpop.f32.mrb[22].mxu0  ;;  %v383_v22 = vpop.f32.mrb[22].mxu1 }
 0x13a   :  { %442 = vst.msk [vmem:[%s753_s3 + $0x10] sm:$0xff] %vm439_vm2, %v434_v19  ;;  %v428_v23 = vadd.f32 %v709_v56, %v414_v20  ;;  %v401_v24 = vmax.f32 %v278_v38, %v313_v21  ;;  %v408_v25 = vmax.f32 %v348_v39, %v383_v22  ;;  %v315_v26 = vpop.f32.mrb[23].mxu0  ;;  %v385_v27 = vpop.f32.mrb[23].mxu1 }
 0x13c   :  { %v435_v28 = vmax.f32 %v428_v23, 0.0  ;;  %v415_v29 = vmax.f32 %v401_v24, %v408_v25 }
 0x13d   :  { %v318_v30 = vpop.f32.mrb[24].mxu0  ;;  %v388_v31 = vpop.f32.mrb[24].mxu1 }
 0x13e   :  { %443 = vst.msk [vmem:[%s753_s3 + $0x18] sm:$0xff] %vm439_vm2, %v435_v28  ;;  %v429_v32 = vadd.f32 %v709_v56, %v415_v29  ;;  %v402_v33 = vmax.f32 %v698_v42, %v318_v30  ;;  %v409_v34 = vmax.f32 %v700_v43, %v388_v31  ;;  %v320_v35 = vpop.f32.mrb[25].mxu0  ;;  %v390_v36 = vpop.f32.mrb[25].mxu1 }
 0x140   :  { %v436_v37 = vmax.f32 %v429_v32, 0.0  ;;  %v416_v38 = vmax.f32 %v402_v33, %v409_v34 }
 0x141   :  { %v323_v39 = vpop.f32.mrb[26].mxu0  ;;  %v393_v40 = vpop.f32.mrb[26].mxu1 }
 0x142   :  { %444 = vst.msk [vmem:[%s753_s3 + $0x20] sm:$0xff] %vm439_vm2, %v436_v37  ;;  %v430_v41 = vadd.f32 %v709_v56, %v416_v38  ;;  %v403_v44 = vmax.f32 %v702_v46, %v323_v39  ;;  %v410_v45 = vmax.f32 %v704_v47, %v393_v40  ;;  %v325_v42 = vpop.f32.mrb[27].mxu0  ;;  %v395_v48 = vpop.f32.mrb[27].mxu1 }
 0x144   :  { %v437_v43 = vmax.f32 %v430_v41, 0.0  ;;  %v417_v49 = vmax.f32 %v403_v44, %v410_v45 }
 0x146   :  { %445 = vst.msk [vmem:[%s753_s3 + $0x28] sm:$0xff] %vm439_vm2, %v437_v43  ;;  %v431_v50 = vadd.f32 %v709_v56, %v417_v49 }
 0x148   :  { %v438_v51 = vmax.f32 %v431_v50, 0.0 }
 0x14a   :  { %446 = vst.msk [vmem:[%s753_s3 + $0x30] sm:$0xff] %vm439_vm2, %v438_v51 }
 0x14b   :  { %451 = vsyncpa [#allocation3], 1 }

</bundles_post_ra>
